<compile_context>
chip_gen: v6e
topology: v6e:2x2x1
jax: 0.10.0
libtpu: 0.0.40
codegen_flags: <defaults>
</compile_context>

<pallas_src>
import jax
import jax.numpy as jnp
from jax import lax
from jax.experimental import pallas as pl
from jax.experimental.pallas import tpu as pltpu


def _control_unit_kernel(q_ref, prev_ref, ctx_ref, len_ref,
                         wci_ref, bci_ref, wu_ref, bu_ref,
                         wcc_ref, bcc_ref, wattn_ref, battn_ref,
                         out_ref,
                         g_sc, m_sc, s_sc, acc_sc):
    f32 = jnp.float32
    ki = pl.program_id(1)
    tl = ctx_ref.shape[1]

    @pl.when(ki == 0)
    def _init():
        # question transform: tanh(q @ W_ci + b_ci) @ W_u[step] + b_u[step]
        q = jnp.tanh(jnp.dot(q_ref[...], wci_ref[...], preferred_element_type=f32)
                     + bci_ref[...])
        q = jnp.dot(q, wu_ref[...], preferred_element_type=f32) + bu_ref[...]
        # fused cont_control: tanh([prev | q] @ W_cc + b_cc)  -- single K=2D matmul
        xcat = jnp.concatenate([prev_ref[...], q], axis=-1)
        cc = jnp.tanh(jnp.dot(xcat, wcc_ref[...], preferred_element_type=f32)
                      + bcc_ref[...])
        # fold the attn weight vector into the control vector once ([TB, D] VPU mult)
        g_sc[...] = cc * wattn_ref[...]
        # online-softmax state
        m_sc[...] = jnp.full(m_sc.shape, -jnp.inf, f32)
        s_sc[...] = jnp.zeros(s_sc.shape, f32)
        acc_sc[...] = jnp.zeros(acc_sc.shape, f32)

    ctx = ctx_ref[...]                                                   # [TB, TL, D]
    # attention logits for this L tile (single pass over ctx, no `inter` temporary)
    logits = jnp.sum(ctx * g_sc[...][:, None, :], axis=-1) + battn_ref[...]   # [TB, TL]

    # mask_by_length (global sequence positions for this tile)
    pos = lax.broadcasted_iota(jnp.int32, logits.shape, 1) + ki * tl
    logits = jnp.where(pos < len_ref[...], logits, jnp.float32(-1e30))

    # online softmax, unnormalized
    m_prev = m_sc[...]
    m_new = jnp.maximum(m_prev, jnp.max(logits, axis=-1, keepdims=True))
    alpha = jnp.exp(m_prev - m_new)
    e = jnp.exp(logits - m_new)                                          # [TB, TL]
    s_sc[...] = alpha * s_sc[...] + jnp.sum(e, axis=-1, keepdims=True)
    acc_sc[...] = alpha * acc_sc[...] + jnp.sum(e[:, :, None] * ctx, axis=1)
    m_sc[...] = m_new

    @pl.when(ki == pl.num_programs(1) - 1)
    def _finalize():
        # deferred normalization: one EUP approx reciprocal instead of B*L divides
        out_ref[...] = (acc_sc[...] *
                        pl.reciprocal(s_sc[...], approx=True)).astype(out_ref.dtype)


def _round_up(x, m):
    return ((x + m - 1) // m) * m


def _pad2(x, rows, cols):
    return jnp.pad(x, ((0, rows - x.shape[0]), (0, cols - x.shape[1])))


def control_unit_forward(params, question, context, question_lengths, step,
                         prev_control, *, batch_tile=8, seq_tile=None):
    """Pallas implementation of ControlUnit.forward (control_feed_prev=True,
    separate_syntax_semantics=False, control_cont_activation='TANH')."""
    f32 = jnp.float32
    B, D = question.shape
    _, L, _ = context.shape

    # lane/sublane-dense padded shapes and tiles
    Dp = _round_up(D, 128)
    TB = batch_tile
    Bp = _round_up(B, TB)
    if seq_tile is None:
        seq_tile = min(512, _round_up(L, 8))
    TL = seq_tile
    Lp = _round_up(L, TL)

    # step-dependent weight selection (plain JAX glue)
    wu = params["w_u"][step]                   # (D, D), already transposed
    bu = params["b_u"][step]                   # (1, D)

    # zero-padding keeps the math exact (padded lanes propagate zeros everywhere)
    q_p = _pad2(question.astype(f32), Bp, Dp)
    prev_p = _pad2(prev_control.astype(f32), Bp, Dp)
    ctx_p = jnp.pad(context.astype(f32), ((0, Bp - B), (0, Lp - L), (0, Dp - D)))
    len_p = jnp.pad(question_lengths.astype(jnp.int32).reshape(B, 1),
                    ((0, Bp - B), (0, 0)))    # padded rows: len=0 -> fully masked

    wci_p = _pad2(params["w_ci"], Dp, Dp)
    bci_p = _pad2(params["b_ci"], 1, Dp)
    wu_p = _pad2(wu, Dp, Dp)
    bu_p = _pad2(bu, 1, Dp)
    bcc_p = _pad2(params["b_cc"], 1, Dp)
    wattn_p = _pad2(params["w_attn"], 1, Dp)
    battn = params["b_attn"].astype(f32)       # (1, 1)

    # fused cont_control weight: rows [0:D] act on prev_control, rows [Dp:Dp+D] on q
    wcc = params["w_cc"]                       # (2D, D) = [W_prev ; W_q], transposed
    wcc_p = jnp.zeros((2 * Dp, Dp), f32)
    wcc_p = wcc_p.at[:D, :D].set(wcc[:D])
    wcc_p = wcc_p.at[Dp:Dp + D, :D].set(wcc[D:])

    grid = (Bp // TB, Lp // TL)

    # TODO(synk): on v5e, if the ctx DMA is still exposed, bump the ctx BlockSpec with
    # pipeline_mode=pl.Buffered(3); and question_lengths / b_attn could move to SMEM.
    grid_spec = pltpu.PrefetchScalarGridSpec(
        num_scalar_prefetch=0,
        grid=grid,
        in_specs=[
            pl.BlockSpec((TB, Dp), lambda i, k: (i, 0)),          # question
            pl.BlockSpec((TB, Dp), lambda i, k: (i, 0)),          # prev_control
            pl.BlockSpec((TB, TL, Dp), lambda i, k: (i, k, 0)),   # context (streamed)
            pl.BlockSpec((TB, 1), lambda i, k: (i, 0)),           # lengths (int32)
            pl.BlockSpec((Dp, Dp), lambda i, k: (0, 0)),          # w_ci
            pl.BlockSpec((1, Dp), lambda i, k: (0, 0)),           # b_ci
            pl.BlockSpec((Dp, Dp), lambda i, k: (0, 0)),          # w_u[step]
            pl.BlockSpec((1, Dp), lambda i, k: (0, 0)),           # b_u[step]
            pl.BlockSpec((2 * Dp, Dp), lambda i, k: (0, 0)),      # w_cc (fused 2D -> D)
            pl.BlockSpec((1, Dp), lambda i, k: (0, 0)),           # b_cc
            pl.BlockSpec((1, Dp), lambda i, k: (0, 0)),           # w_attn
            pl.BlockSpec((1, 1), lambda i, k: (0, 0)),            # b_attn
        ],
        out_specs=pl.BlockSpec((TB, Dp), lambda i, k: (i, 0)),
        scratch_shapes=[
            pltpu.VMEM((TB, Dp), jnp.float32),   # g = cc * w_attn
            pltpu.VMEM((TB, 1), jnp.float32),    # running max m
            pltpu.VMEM((TB, 1), jnp.float32),    # running sum s
            pltpu.VMEM((TB, Dp), jnp.float32),   # unnormalized accumulator
        ],
    )

    out = pl.pallas_call(
        _control_unit_kernel,
        out_shape=jax.ShapeDtypeStruct((Bp, Dp), f32),
        grid_spec=grid_spec,
        compiler_params=pltpu.CompilerParams(
            dimension_semantics=("parallel", "arbitrary")),
    )(q_p, prev_p, ctx_p, len_p,
      wci_p, bci_p, wu_p, bu_p,
      wcc_p, bcc_p, wattn_p, battn)

    return out[:B, :D]


def init_params(key, module_dim, max_step=4):
    D = module_dim
    ks = jax.random.split(key, 8)
    scale = 0.1
    # attn: Linear(D, 1)
    w_attn = scale * jax.random.normal(ks[0], (1, D), jnp.float32)    # torch weight (1, D)
    b_attn = scale * jax.random.normal(ks[1], (1, 1), jnp.float32)
    # control_input: Linear(D, D)
    w_ci = scale * jax.random.normal(ks[2], (D, D), jnp.float32)
    b_ci = scale * jax.random.normal(ks[3], (1, D), jnp.float32)
    # cont_control: Linear(2D, D)
    w_cc = scale * jax.random.normal(ks[4], (D, 2 * D), jnp.float32)  # torch weight (D, 2D)
    b_cc = scale * jax.random.normal(ks[5], (1, D), jnp.float32)
    # control_input_u: max_step x Linear(D, D)
    w_u = scale * jax.random.normal(ks[6], (max_step, D, D), jnp.float32)
    b_u = scale * jax.random.normal(ks[7], (max_step, 1, D), jnp.float32)
    return {
        "w_attn": w_attn,                       # (1, D)
        "b_attn": b_attn,                       # (1, 1)
        "w_ci": w_ci.T,                         # (D, D) transposed for x @ W
        "b_ci": b_ci,
        "w_cc": w_cc.T,                         # (2D, D): rows 0:D prev part, D:2D q part
        "b_cc": b_cc,
        "w_u": jnp.transpose(w_u, (0, 2, 1)),   # (max_step, D, D) transposed
        "b_u": b_u,                             # (max_step, 1, D)
    }


def _reference_jax(params, question, context, question_lengths, step, prev_control):
    # pure-JAX reference for sanity checking (matches the PyTorch forward)
    q = jnp.tanh(question @ params["w_ci"] + params["b_ci"])
    q = q @ params["w_u"][step] + params["b_u"][step]
    cc = jnp.tanh(jnp.concatenate([prev_control, q], axis=-1) @ params["w_cc"]
                  + params["b_cc"])
    inter = cc[:, None, :] * context
    logits = jnp.sum(inter * params["w_attn"][None, :, :], axis=-1) + params["b_attn"]
    B, L, _ = context.shape
    pos = jnp.arange(L, dtype=jnp.int32)[None, :]
    valid = pos < question_lengths.astype(jnp.int32)[:, None]
    logits = jnp.where(valid, logits, -1e30)
    attn = jax.nn.softmax(logits, axis=1)
    return jnp.sum(attn[:, :, None] * context, axis=1)


if __name__ == "__main__":
    B, L, D = 10, 24, 32
    max_step = 4
    step = 2

    key = jax.random.PRNGKey(0)
    k_p, k_q, k_c, k_pc, k_len = jax.random.split(key, 5)

    params = init_params(k_p, D, max_step)
    question = jax.random.normal(k_q, (B, D), jnp.float32)
    context = jax.random.normal(k_c, (B, L, D), jnp.float32)
    prev_control = jax.random.normal(k_pc, (B, D), jnp.float32)
    question_lengths = jax.random.randint(k_len, (B,), 1, L + 1).astype(jnp.int32)
    question_lengths = question_lengths.at[0].set(L)   # keep max(lengths) == L (as in torch)

    # seq_tile=8 exercises the multi-tile online-softmax path (grid = (2, 3) after padding)
    out = control_unit_forward(params, question, context, question_lengths,
                               step, prev_control, seq_tile=8)
    out = jax.block_until_ready(out)

    ref = _reference_jax(params, question, context, question_lengths, step, prev_control)
    assert out.shape == (B, D)
    assert bool(jnp.all(jnp.isfinite(out)))
    assert bool(jnp.allclose(out, ref, atol=1e-2, rtol=1e-2)), \
        float(jnp.max(jnp.abs(out - ref)))

    print("KERNEL_OK")
</pallas_src>

<mosaic_0001>
module attributes {stable_mosaic.version = 11 : i64} {
  func.func @_control_unit_kernel(%arg0: i32, %arg1: i32, %arg2: memref<8x128xf32, #tpu.memory_space<vmem>>, %arg3: memref<8x128xf32, #tpu.memory_space<vmem>>, %arg4: memref<8x8x128xf32, #tpu.memory_space<vmem>>, %arg5: memref<8x1xi32, #tpu.memory_space<vmem>>, %arg6: memref<128x128xf32, #tpu.memory_space<vmem>>, %arg7: memref<1x128xf32, #tpu.memory_space<vmem>>, %arg8: memref<128x128xf32, #tpu.memory_space<vmem>>, %arg9: memref<1x128xf32, #tpu.memory_space<vmem>>, %arg10: memref<256x128xf32, #tpu.memory_space<vmem>>, %arg11: memref<1x128xf32, #tpu.memory_space<vmem>>, %arg12: memref<1x128xf32, #tpu.memory_space<vmem>>, %arg13: memref<1x1xf32, #tpu.memory_space<vmem>>, %arg14: memref<8x128xf32, #tpu.memory_space<vmem>>, %arg15: memref<8x128xf32, #tpu.memory_space<vmem>>, %arg16: memref<8x1xf32, #tpu.memory_space<vmem>>, %arg17: memref<8x1xf32, #tpu.memory_space<vmem>>, %arg18: memref<8x128xf32, #tpu.memory_space<vmem>>) attributes {dimension_semantics = [#tpu.dimension_semantics<parallel>, #tpu.dimension_semantics<arbitrary>], iteration_bounds = array<i64: 2, 3>, scalar_prefetch = 0 : i64, scratch_operands = 4 : i64, tpu.core_type = #tpu.core_type<tc>, window_params = [{transform_indices = @transform_0, window_bounds = array<i64: 8, 128>}, {transform_indices = @transform_1, window_bounds = array<i64: 8, 128>}, {transform_indices = @transform_2, window_bounds = array<i64: 8, 8, 128>}, {transform_indices = @transform_3, window_bounds = array<i64: 8, 1>}, {pipeline_mode = #tpu.pipeline_mode<synchronous>, transform_indices = @transform_4, window_bounds = array<i64: 128, 128>}, {pipeline_mode = #tpu.pipeline_mode<synchronous>, transform_indices = @transform_5, window_bounds = array<i64: 1, 128>}, {pipeline_mode = #tpu.pipeline_mode<synchronous>, transform_indices = @transform_6, window_bounds = array<i64: 128, 128>}, {pipeline_mode = #tpu.pipeline_mode<synchronous>, transform_indices = @transform_7, window_bounds = array<i64: 1, 128>}, {pipeline_mode = #tpu.pipeline_mode<synchronous>, transform_indices = @transform_8, window_bounds = array<i64: 256, 128>}, {pipeline_mode = #tpu.pipeline_mode<synchronous>, transform_indices = @transform_9, window_bounds = array<i64: 1, 128>}, {pipeline_mode = #tpu.pipeline_mode<synchronous>, transform_indices = @transform_10, window_bounds = array<i64: 1, 128>}, {pipeline_mode = #tpu.pipeline_mode<synchronous>, transform_indices = @transform_11, window_bounds = array<i64: 1, 1>}, {transform_indices = @transform_12, window_bounds = array<i64: 8, 128>}]} {
    %c0_i32 = arith.constant 0 : i32
    %0 = arith.cmpi eq, %arg1, %c0_i32 : i32
    %1 = arith.extui %0 : i1 to i32
    %c0_i32_0 = arith.constant 0 : i32
    %2 = arith.cmpi ne, %1, %c0_i32_0 : i32
    scf.if %2 {
      %c0_26 = arith.constant 0 : index
      %c0_27 = arith.constant 0 : index
      %49 = vector.load %arg2[%c0_26, %c0_27] : memref<8x128xf32, #tpu.memory_space<vmem>>, vector<8x128xf32>
      %c0_28 = arith.constant 0 : index
      %c0_29 = arith.constant 0 : index
      %50 = vector.load %arg6[%c0_28, %c0_29] : memref<128x128xf32, #tpu.memory_space<vmem>>, vector<128x128xf32>
      %cst_30 = arith.constant dense<0.000000e+00> : vector<8x128xf32>
      %51 = tpu.matmul %49, %50, %cst_30 {dimension_numbers = #tpu.dot_dimension_numbers<[1], [0], [0], [1], [0, 0, 1, 1], [], []>} : vector<8x128xf32>, vector<128x128xf32>, vector<8x128xf32> -> vector<8x128xf32>
      %c0_31 = arith.constant 0 : index
      %c0_32 = arith.constant 0 : index
      %52 = vector.load %arg7[%c0_31, %c0_32] : memref<1x128xf32, #tpu.memory_space<vmem>>, vector<1x128xf32>
      %53 = vector.broadcast %52 : vector<1x128xf32> to vector<8x128xf32>
      %54 = arith.addf %51, %53 : vector<8x128xf32>
      %55 = math.tanh %54 : vector<8x128xf32>
      %c0_33 = arith.constant 0 : index
      %c0_34 = arith.constant 0 : index
      %56 = vector.load %arg8[%c0_33, %c0_34] : memref<128x128xf32, #tpu.memory_space<vmem>>, vector<128x128xf32>
      %cst_35 = arith.constant dense<0.000000e+00> : vector<8x128xf32>
      %57 = tpu.matmul %55, %56, %cst_35 {dimension_numbers = #tpu.dot_dimension_numbers<[1], [0], [0], [1], [0, 0, 1, 1], [], []>} : vector<8x128xf32>, vector<128x128xf32>, vector<8x128xf32> -> vector<8x128xf32>
      %c0_36 = arith.constant 0 : index
      %c0_37 = arith.constant 0 : index
      %58 = vector.load %arg9[%c0_36, %c0_37] : memref<1x128xf32, #tpu.memory_space<vmem>>, vector<1x128xf32>
      %59 = vector.broadcast %58 : vector<1x128xf32> to vector<8x128xf32>
      %60 = arith.addf %57, %59 : vector<8x128xf32>
      %c0_38 = arith.constant 0 : index
      %c0_39 = arith.constant 0 : index
      %61 = vector.load %arg3[%c0_38, %c0_39] : memref<8x128xf32, #tpu.memory_space<vmem>>, vector<8x128xf32>
      %62 = tpu.concatenate %61, %60 in 1 : vector<8x128xf32>, vector<8x128xf32> -> vector<8x256xf32>
      %c0_40 = arith.constant 0 : index
      %c0_41 = arith.constant 0 : index
      %63 = vector.load %arg10[%c0_40, %c0_41] : memref<256x128xf32, #tpu.memory_space<vmem>>, vector<256x128xf32>
      %cst_42 = arith.constant dense<0.000000e+00> : vector<8x128xf32>
      %64 = tpu.matmul %62, %63, %cst_42 {dimension_numbers = #tpu.dot_dimension_numbers<[1], [0], [0], [1], [0, 0, 1, 1], [], []>} : vector<8x256xf32>, vector<256x128xf32>, vector<8x128xf32> -> vector<8x128xf32>
      %c0_43 = arith.constant 0 : index
      %c0_44 = arith.constant 0 : index
      %65 = vector.load %arg11[%c0_43, %c0_44] : memref<1x128xf32, #tpu.memory_space<vmem>>, vector<1x128xf32>
      %66 = vector.broadcast %65 : vector<1x128xf32> to vector<8x128xf32>
      %67 = arith.addf %64, %66 : vector<8x128xf32>
      %68 = math.tanh %67 : vector<8x128xf32>
      %c0_45 = arith.constant 0 : index
      %c0_46 = arith.constant 0 : index
      %69 = vector.load %arg12[%c0_45, %c0_46] : memref<1x128xf32, #tpu.memory_space<vmem>>, vector<1x128xf32>
      %70 = vector.broadcast %69 : vector<1x128xf32> to vector<8x128xf32>
      %71 = arith.mulf %68, %70 : vector<8x128xf32>
      %c0_47 = arith.constant 0 : index
      %c0_48 = arith.constant 0 : index
      %72 = vector.load %arg15[%c0_47, %c0_48] : memref<8x128xf32, #tpu.memory_space<vmem>>, vector<8x128xf32>
      tpu.vector_store %arg15[%c0_47, %c0_48], %71 {strides = array<i32>} : memref<8x128xf32, #tpu.memory_space<vmem>>, vector<8x128xf32>,
      %cst_49 = arith.constant 0xFF800000 : f32
      %73 = vector.broadcast %cst_49 : f32 to vector<8x1xf32>
      %c0_50 = arith.constant 0 : index
      %c0_51 = arith.constant 0 : index
      %74 = vector.load %arg16[%c0_50, %c0_51] : memref<8x1xf32, #tpu.memory_space<vmem>>, vector<8x1xf32>
      tpu.vector_store %arg16[%c0_50, %c0_51], %73 {strides = array<i32>} : memref<8x1xf32, #tpu.memory_space<vmem>>, vector<8x1xf32>,
      %cst_52 = arith.constant 0.000000e+00 : f32
      %75 = vector.broadcast %cst_52 : f32 to vector<8x1xf32>
      %c0_53 = arith.constant 0 : index
      %c0_54 = arith.constant 0 : index
      %76 = vector.load %arg17[%c0_53, %c0_54] : memref<8x1xf32, #tpu.memory_space<vmem>>, vector<8x1xf32>
      tpu.vector_store %arg17[%c0_53, %c0_54], %75 {strides = array<i32>} : memref<8x1xf32, #tpu.memory_space<vmem>>, vector<8x1xf32>,
      %cst_55 = arith.constant 0.000000e+00 : f32
      %77 = vector.broadcast %cst_55 : f32 to vector<8x128xf32>
      %c0_56 = arith.constant 0 : index
      %c0_57 = arith.constant 0 : index
      %78 = vector.load %arg18[%c0_56, %c0_57] : memref<8x128xf32, #tpu.memory_space<vmem>>, vector<8x128xf32>
      tpu.vector_store %arg18[%c0_56, %c0_57], %77 {strides = array<i32>} : memref<8x128xf32, #tpu.memory_space<vmem>>, vector<8x128xf32>,
    } else {
    }
    %c0 = arith.constant 0 : index
    %c0_1 = arith.constant 0 : index
    %c0_2 = arith.constant 0 : index
    %3 = vector.load %arg4[%c0, %c0_1, %c0_2] : memref<8x8x128xf32, #tpu.memory_space<vmem>>, vector<8x8x128xf32>
    %c0_3 = arith.constant 0 : index
    %c0_4 = arith.constant 0 : index
    %4 = vector.load %arg15[%c0_3, %c0_4] : memref<8x128xf32, #tpu.memory_space<vmem>>, vector<8x128xf32>
    %5 = vector.shape_cast %4 : vector<8x128xf32> to vector<8x1x128xf32>
    %6 = vector.broadcast %5 : vector<8x1x128xf32> to vector<8x8x128xf32>
    %7 = arith.mulf %3, %6 : vector<8x8x128xf32>
    %cst = arith.constant dense<0.000000e+00> : vector<8x8xf32>
    %8 = vector.multi_reduction <add>, %7, %cst [2] : vector<8x8x128xf32> to vector<8x8xf32>
    %c0_5 = arith.constant 0 : index
    %c0_6 = arith.constant 0 : index
    %9 = vector.load %arg13[%c0_5, %c0_6] : memref<1x1xf32, #tpu.memory_space<vmem>>, vector<1x1xf32>
    %10 = vector.broadcast %9 : vector<1x1xf32> to vector<8x8xf32>
    %11 = arith.addf %8, %10 : vector<8x8xf32>
    %12 = tpu.iota {dimensions = array<i32: 1>} : vector<8x8xi32>
    %c8_i32 = arith.constant 8 : i32
    %13 = arith.muli %arg1, %c8_i32 : i32
    %14 = vector.broadcast %13 : i32 to vector<8x8xi32>
    %15 = arith.addi %12, %14 : vector<8x8xi32>
    %c0_7 = arith.constant 0 : index
    %c0_8 = arith.constant 0 : index
    %16 = vector.load %arg5[%c0_7, %c0_8] : memref<8x1xi32, #tpu.memory_space<vmem>>, vector<8x1xi32>
    %17 = vector.broadcast %16 : vector<8x1xi32> to vector<8x8xi32>
    %18 = arith.cmpi slt, %15, %17 : vector<8x8xi32>
    %cst_9 = arith.constant -1.000000e+30 : f32
    %19 = vector.broadcast %cst_9 : f32 to vector<8x8xf32>
    %20 = arith.select %18, %11, %19 : vector<8x8xi1>, vector<8x8xf32>
    %c0_10 = arith.constant 0 : index
    %c0_11 = arith.constant 0 : index
    %21 = vector.load %arg16[%c0_10, %c0_11] : memref<8x1xf32, #tpu.memory_space<vmem>>, vector<8x1xf32>
    %cst_12 = arith.constant dense<0xFF800000> : vector<8xf32>
    %22 = vector.multi_reduction <maximumf>, %20, %cst_12 [1] : vector<8x8xf32> to vector<8xf32>
    %23 = vector.shape_cast %22 : vector<8xf32> to vector<8x1xf32>
    %24 = arith.maximumf %21, %23 : vector<8x1xf32>
    %25 = arith.subf %21, %24 : vector<8x1xf32>
    %26 = math.exp %25 : vector<8x1xf32>
    %27 = vector.broadcast %24 : vector<8x1xf32> to vector<8x8xf32>
    %28 = arith.subf %20, %27 : vector<8x8xf32>
    %29 = math.exp %28 : vector<8x8xf32>
    %c0_13 = arith.constant 0 : index
    %c0_14 = arith.constant 0 : index
    %30 = vector.load %arg17[%c0_13, %c0_14] : memref<8x1xf32, #tpu.memory_space<vmem>>, vector<8x1xf32>
    %31 = arith.mulf %26, %30 : vector<8x1xf32>
    %cst_15 = arith.constant dense<0.000000e+00> : vector<8xf32>
    %32 = vector.multi_reduction <add>, %29, %cst_15 [1] : vector<8x8xf32> to vector<8xf32>
    %33 = vector.shape_cast %32 : vector<8xf32> to vector<8x1xf32>
    %34 = arith.addf %31, %33 : vector<8x1xf32>
    %c0_16 = arith.constant 0 : index
    %c0_17 = arith.constant 0 : index
    %35 = vector.load %arg17[%c0_16, %c0_17] : memref<8x1xf32, #tpu.memory_space<vmem>>, vector<8x1xf32>
    tpu.vector_store %arg17[%c0_16, %c0_17], %34 {strides = array<i32>} : memref<8x1xf32, #tpu.memory_space<vmem>>, vector<8x1xf32>,
    %c0_18 = arith.constant 0 : index
    %c0_19 = arith.constant 0 : index
    %36 = vector.load %arg18[%c0_18, %c0_19] : memref<8x128xf32, #tpu.memory_space<vmem>>, vector<8x128xf32>
    %37 = vector.broadcast %26 : vector<8x1xf32> to vector<8x128xf32>
    %38 = arith.mulf %37, %36 : vector<8x128xf32>
    %39 = vector.shape_cast %29 : vector<8x8xf32> to vector<8x8x1xf32>
    %40 = vector.broadcast %39 : vector<8x8x1xf32> to vector<8x8x128xf32>
    %41 = arith.mulf %40, %3 : vector<8x8x128xf32>
    %cst_20 = arith.constant dense<0.000000e+00> : vector<8x128xf32>
    %42 = vector.multi_reduction <add>, %41, %cst_20 [1] : vector<8x8x128xf32> to vector<8x128xf32>
    %43 = arith.addf %38, %42 : vector<8x128xf32>
    %c0_21 = arith.constant 0 : index
    %c0_22 = arith.constant 0 : index
    %44 = vector.load %arg18[%c0_21, %c0_22] : memref<8x128xf32, #tpu.memory_space<vmem>>, vector<8x128xf32>
    tpu.vector_store %arg18[%c0_21, %c0_22], %43 {strides = array<i32>} : memref<8x128xf32, #tpu.memory_space<vmem>>, vector<8x128xf32>,
    %c0_23 = arith.constant 0 : index
    %c0_24 = arith.constant 0 : index
    %45 = vector.load %arg16[%c0_23, %c0_24] : memref<8x1xf32, #tpu.memory_space<vmem>>, vector<8x1xf32>
    tpu.vector_store %arg16[%c0_23, %c0_24], %24 {strides = array<i32>} : memref<8x1xf32, #tpu.memory_space<vmem>>, vector<8x1xf32>,
    %c2_i32 = arith.constant 2 : i32
    %46 = arith.cmpi eq, %arg1, %c2_i32 : i32
    %47 = arith.extui %46 : i1 to i32
    %c0_i32_25 = arith.constant 0 : i32
    %48 = arith.cmpi ne, %47, %c0_i32_25 : i32
    scf.if %48 {
      %c0_26 = arith.constant 0 : index
      %c0_27 = arith.constant 0 : index
      %49 = vector.load %arg18[%c0_26, %c0_27] : memref<8x128xf32, #tpu.memory_space<vmem>>, vector<8x128xf32>
      %c0_28 = arith.constant 0 : index
      %c0_29 = arith.constant 0 : index
      %50 = vector.load %arg17[%c0_28, %c0_29] : memref<8x1xf32, #tpu.memory_space<vmem>>, vector<8x1xf32>
      %51 = tpu.reciprocal %50 {approx = true} : vector<8x1xf32> -> vector<8x1xf32>
      %52 = vector.broadcast %51 : vector<8x1xf32> to vector<8x128xf32>
      %53 = arith.mulf %49, %52 : vector<8x128xf32>
      %c0_30 = arith.constant 0 : index
      %c0_31 = arith.constant 0 : index
      %54 = vector.load %arg14[%c0_30, %c0_31] : memref<8x128xf32, #tpu.memory_space<vmem>>, vector<8x128xf32>
      tpu.vector_store %arg14[%c0_30, %c0_31], %53 {strides = array<i32>} : memref<8x128xf32, #tpu.memory_space<vmem>>, vector<8x128xf32>,
    } else {
    }
    return
  }
  func.func @transform_0(%arg0: i32, %arg1: i32) -> (i32, i32) {
    %c0_i32 = arith.constant 0 : i32
    %c0_i32_0 = arith.constant 0 : i32
    return %arg0, %c0_i32 : i32, i32
  }
  func.func @transform_1(%arg0: i32, %arg1: i32) -> (i32, i32) {
    %c0_i32 = arith.constant 0 : i32
    %c0_i32_0 = arith.constant 0 : i32
    return %arg0, %c0_i32 : i32, i32
  }
  func.func @transform_2(%arg0: i32, %arg1: i32) -> (i32, i32, i32) {
    %c0_i32 = arith.constant 0 : i32
    %c0_i32_0 = arith.constant 0 : i32
    return %arg0, %arg1, %c0_i32 : i32, i32, i32
  }
  func.func @transform_3(%arg0: i32, %arg1: i32) -> (i32, i32) {
    %c0_i32 = arith.constant 0 : i32
    %c0_i32_0 = arith.constant 0 : i32
    return %arg0, %c0_i32 : i32, i32
  }
  func.func @transform_4(%arg0: i32, %arg1: i32) -> (i32, i32) {
    %c0_i32 = arith.constant 0 : i32
    %c0_i32_0 = arith.constant 0 : i32
    %c0_i32_1 = arith.constant 0 : i32
    return %c0_i32, %c0_i32_0 : i32, i32
  }
  func.func @transform_5(%arg0: i32, %arg1: i32) -> (i32, i32) {
    %c0_i32 = arith.constant 0 : i32
    %c0_i32_0 = arith.constant 0 : i32
    %c0_i32_1 = arith.constant 0 : i32
    return %c0_i32, %c0_i32_0 : i32, i32
  }
  func.func @transform_6(%arg0: i32, %arg1: i32) -> (i32, i32) {
    %c0_i32 = arith.constant 0 : i32
    %c0_i32_0 = arith.constant 0 : i32
    %c0_i32_1 = arith.constant 0 : i32
    return %c0_i32, %c0_i32_0 : i32, i32
  }
  func.func @transform_7(%arg0: i32, %arg1: i32) -> (i32, i32) {
    %c0_i32 = arith.constant 0 : i32
    %c0_i32_0 = arith.constant 0 : i32
    %c0_i32_1 = arith.constant 0 : i32
    return %c0_i32, %c0_i32_0 : i32, i32
  }
  func.func @transform_8(%arg0: i32, %arg1: i32) -> (i32, i32) {
    %c0_i32 = arith.constant 0 : i32
    %c0_i32_0 = arith.constant 0 : i32
    %c0_i32_1 = arith.constant 0 : i32
    return %c0_i32, %c0_i32_0 : i32, i32
  }
  func.func @transform_9(%arg0: i32, %arg1: i32) -> (i32, i32) {
    %c0_i32 = arith.constant 0 : i32
    %c0_i32_0 = arith.constant 0 : i32
    %c0_i32_1 = arith.constant 0 : i32
    return %c0_i32, %c0_i32_0 : i32, i32
  }
  func.func @transform_10(%arg0: i32, %arg1: i32) -> (i32, i32) {
    %c0_i32 = arith.constant 0 : i32
    %c0_i32_0 = arith.constant 0 : i32
    %c0_i32_1 = arith.constant 0 : i32
    return %c0_i32, %c0_i32_0 : i32, i32
  }
  func.func @transform_11(%arg0: i32, %arg1: i32) -> (i32, i32) {
    %c0_i32 = arith.constant 0 : i32
    %c0_i32_0 = arith.constant 0 : i32
    %c0_i32_1 = arith.constant 0 : i32
    return %c0_i32, %c0_i32_0 : i32, i32
  }
  func.func @transform_12(%arg0: i32, %arg1: i32) -> (i32, i32) {
    %c0_i32 = arith.constant 0 : i32
    %c0_i32_0 = arith.constant 0 : i32
    return %arg0, %c0_i32 : i32, i32
  }
}

</mosaic_0001>

<bundles_post_ra>
// kernel: tpu_custom_call.1
= control target key start
LH: loop header
LB: loop body
LE: loop exit
PB: predicated region body
PF: predicated region fallthrough
CT: control target
= control target key end

     0   :  { %s2577_s0 = inlined_call_operand.vmem [shape: f32[16,128], index: 0, kind: input, shape index: {}]   ;;  %s2578_s1 = inlined_call_operand.hbm [shape: f32[16,128], index: 1, kind: input, shape index: {}]   ;;  %s2579_s2 = inlined_call_operand.hbm [shape: f32[16,24,128], index: 2, kind: input, shape index: {}]   ;;  %s2580_s3 = inlined_call_operand.vmem [shape: s32[16,1], index: 3, kind: input, shape index: {}]   ;;  %s2581_s4 = inlined_call_operand.hbm [shape: f32[128,128], index: 4, kind: input, shape index: {}]   ;;  %s2582_s5 = inlined_call_operand.vmem [shape: f32[1,128], index: 5, kind: input, shape index: {}]   ;;  %s2583_s6 = inlined_call_operand.hbm [shape: f32[128,128], index: 6, kind: input, shape index: {}]   ;;  %s2584_s7 = inlined_call_operand.vmem [shape: f32[1,128], index: 7, kind: input, shape index: {}]   ;;  %s2585_s8 = inlined_call_operand.hbm [shape: f32[256,128], index: 8, kind: input, shape index: {}]   ;;  %s2586_s9 = inlined_call_operand.vmem [shape: f32[1,128], index: 9, kind: input, shape index: {}]   ;;  %s2587_s10 = inlined_call_operand.vmem [shape: f32[1,128], index: 10, kind: input, shape index: {}]   ;;  %s2588_s11 = inlined_call_operand.<no memory space> [shape: f32[1,1], index: 11, kind: input, shape index: {}]   ;;  %s2589_s12 = inlined_call_operand.hbm [shape: f32[16,128], index: 12, kind: output, shape index: {}]  }
   0x1   :  { %2606 = sst [smem:[#allocation32_spill]] %s2578_s1  ;;  %v17_v0 = vstv %s2588_s11 }
   0x2   :  { %2607 = sst [smem:[#allocation33_spill]] %s2581_s4  ;;  %18 = vst [vmem:[#allocation6] sm:$0x1] %v17_v0 }
   0x3   :  { %2608 = sst [smem:[#allocation34_spill]] %s2582_s5 }
   0x4   :  { %2609 = sst [smem:[#allocation35_spill]] %s2583_s6 }
   0x5   :  { %2610 = sst [smem:[#allocation36_spill]] %s2584_s7 }
   0x6   :  { %2611 = sst [smem:[#allocation37_spill]] %s2585_s8 }
   0x7   :  { %2612 = sst [smem:[#allocation38_spill]] %s2586_s9 }
   0x8   :  { %2613 = sst [smem:[#allocation39_spill]] %s2587_s10 }
   0x9   :  { %2614 = sst [smem:[#allocation40_spill]] %s2589_s12 }
   0xa   :  { %19 = vsyncpa [#allocation8], 0 }
   0xb   :  { %21 = vsyncpa [#allocation8 + $0x1], 0 }
   0xc   :  { %22 = vsyncpa [#allocation11], 0 }
   0xd   :  { %24 = vsyncpa [#allocation11 + $0x1], 0 }
   0xe   :  { %25 = vsyncpa [#allocation14], 0 }
   0xf   :  { %26 = vsyncpa [#allocation9], 0 }
  0x10   :  { %28 = vsyncpa [#allocation9 + $0x1], 0  ;;  %s2123_s23 = smov 0   ;;  %s2125_s24 = smov 0  }
  0x11   :  { %s2127_s25 = smov 0   ;;  %s2129_s26 = smov 0  }
  0x12   :  { %s2131_s27 = smov 0   ;;  %s2133_s28 = smov 0  }
  0x13   :  { %s2135_s11 = smov 0   ;;  %s2137_s29 = smov 0  }
  0x14   :  { %s2139_s30 = smov 0   ;;  %s2141_s13 = smov 0  }
  0x15   :  { %s2143_s14 = smov 0  }
  0x16 LB: > { %2615 = sst [smem:[#allocation22_spill]] %s2010_s26  ;;  %s2177_s15 = sadd.s32 4294967295, %s2038_s14   ;;  %s2038_s14 = sphi %s2143_s14, %s34_s14   ;;  %s2034_s13 = sphi %s2141_s13, %s2662_s13   ;;  %s2030_s30 = sphi %s2139_s30, %s2669_s30   ;;  %s2026_s29 = sphi %s2137_s29, %s2660_s29   ;;  %s2022_s11 = sphi %s2135_s11, %s2668_s11   ;;  %s2018_s28 = sphi %s2133_s28, %s2659_s28   ;;  %s2014_s27 = sphi %s2131_s27, %s2667_s27   ;;  %s2010_s26 = sphi %s2129_s26, %s2666_s26   ;;  %s2006_s25 = sphi %s2127_s25, %s2665_s25   ;;  %s2002_s24 = sphi %s2125_s24, %s2664_s24   ;;  %s1998_s23 = sphi %s2123_s23, %s2663_s23  }
  0x17   : > { %2616 = sst [smem:[#allocation23_spill]] %s2018_s28  ;;  %p120_p0 = scmp.ne.s32.totalorder %s2002_s24, %s1998_s23 }
  0x18   : > { %2617 = sst [smem:[#allocation24_spill]] %s2034_s13  ;;  %p2592_p1 = scmp.eq.s32.totalorder %s2177_s15, 0 }
  0x19   : > { %2618 = sst [smem:[#allocation25_spill]] %s2038_s14  ;;  %p1439_p2 = scmp.ge.s32.totalorder %s2038_s14, 1 }
  0x1a   : > { %p351_p3 = scmp.lt.s32.totalorder %s2038_s14, 7  ;;  %p2185_p4 = por %p120_p0, %p2592_p1 }
  0x1b   : > { %s2040_s18 = smov [#allocation12]   ;;  %s2041_s21 = smov [#allocation13]  }
  0x1c   : > { %s2619_s16 = scalar_select %p2185_p4, 1, 0 }
  0x1d   : > { %p2189_p5 = pnand %p1439_p2, %p351_p3  ;;  %s363_s19 = sshll.u32 %s2040_s18, 4  ;;  %s364_s19 = int_to_ptr.vmem [resolvable:$true] %s363_s19 }
  0x1e   : > { %s379_s22 = sshll.u32 %s2041_s21, 4  ;;  %s2042_s23 = smov [#allocation15]   ;;  %s380_s22 = int_to_ptr.vmem [resolvable:$true] %s379_s22 }
  0x1f   : > { %p1629_p6 = pneg %p2189_p5  ;;  %s395_s12 = sshll.u32 %s2042_s23, 4  ;;  %s396_s12 = int_to_ptr.vmem [resolvable:$true] %s395_s12 }
  0x20   : > { %s1783_s10 = scalar_lea.vmem %s364_s19, 2048  ;;  %p1791_p12 = scmp.lt.s32.totalorder %s364_s19, %s364_s19 }
  0x21   : > { %p2197_p7 = pnand %p1629_p6, %p2592_p1  ;;  %p1784_p9 = scmp.ne.s32.totalorder %s364_s19, %s1783_s10 }
  0x22   : > { %p1792_p13 = scmp.lt.s32.totalorder %s1783_s10, %s1783_s10 }
  0x23   : > { %p1774_p8 = pneg %p2197_p7 }
  0x24   : > { %p1793_p0 = por %p1792_p13, %p1791_p12 }
  0x25   : > { %p1786_p10 = pnand %p1784_p9, %p1774_p8 }
  0x27   : > { %p1787_p11 = pneg %p1786_p10 }
  0x29   : > { %p1794_p2 = pnand %p1793_p0, %p1787_p11 }
  0x2b   : > { %1797 = shalt.err (!%p1794_p2)
}
  0x2c   : > { %s2591_s18 = smov 128   ;;  %s2593_s21 = smov 8  }
  0x2d   : > { %s2622_s4 = sld [smem:[#allocation33_spill]]  ;;  %s1809_s7 = scalar_lea.vmem %s380_s22, 2048 }
  0x2e   : > { %p1810_p3 = scmp.ne.s32.totalorder %s380_s22, %s1809_s7  ;;  %p1817_p10 = scmp.lt.s32.totalorder %s380_s22, %s380_s22 }
  0x2f   : > { %p1818_p11 = scmp.lt.s32.totalorder %s1809_s7, %s1809_s7 }
  0x30   : > { %p1812_p6 = pnand %p1810_p3, %p1774_p8 }
  0x31   : > { %p1819_p12 = por %p1818_p11, %p1817_p10 }
  0x32   : > { %p1813_p9 = pneg %p1812_p6 }
  0x33   : > { %1632 = dma.hbm_to_vmem [thread:$0]  (!%p2197_p7), %s2622_s4, 2048, %s364_s19, [#allocation11], %s2591_s18, %s2591_s18, %s2593_s21  }
  0x34   : > { %p1820_p13 = pnand %p1819_p12, %p1813_p9 }
  0x36   : > { %1823 = shalt.err (!%p1820_p13)
}
  0x37   : > { %s2623_s6 = sld [smem:[#allocation35_spill]]  ;;  %s1835_s9 = scalar_lea.vmem %s396_s12, 4096 }
  0x38   : > { %p1836_p0 = scmp.ne.s32.totalorder %s396_s12, %s1835_s9  ;;  %p1843_p6 = scmp.lt.s32.totalorder %s396_s12, %s396_s12 }
  0x39   : > { %p1844_p9 = scmp.lt.s32.totalorder %s1835_s9, %s1835_s9 }
  0x3a   : > { %p1838_p2 = pnand %p1836_p0, %p1774_p8 }
  0x3b   : > { %p1845_p10 = por %p1844_p9, %p1843_p6 }
  0x3c   : > { %p1839_p3 = pneg %p1838_p2 }
  0x3d   : > { %1635 = dma.hbm_to_vmem [thread:$0]  (!%p2197_p7), %s2623_s6, 2048, %s380_s22, [#allocation14], %s2591_s18, %s2591_s18, %s2593_s21  }
  0x3e   : > { %p1846_p11 = pnand %p1845_p10, %p1839_p3 }
  0x40   : > { %1849 = shalt.err (!%p1846_p11)
}
  0x41   : > { %s2624_s8 = sld [smem:[#allocation37_spill]]  ;;  %s1438_s19 = sadd.s32 4294967294, %s2038_s14  }
  0x42   : > { %s43_s20 = sadd.s32 1, %s2030_s30  ;;  %s46_s22 = sadd.s32 1, %s2034_s13 }
  0x43   : > { %p44_p8 = scmp.ge.s32.totalorder %s43_s20, 3  ;;  %s79_s23 = sadd.s32 1, %s2018_s28 }
  0x44   : > { %p86_p12 = scmp.ne.s32.totalorder %s2018_s28, %s2014_s27  ;;  %p87_p13 = scmp.eq.s32.totalorder %s2038_s14, 0 }
  0x45   : > { %s2671_s20 = smov (%p44_p8, %s43_s20), 0  ;;  %s2673_s22 = smov (!%p44_p8, %s46_s22), %s2034_s13 }
  0x46   : > { %2625 = sst [smem:[#allocation26_spill]] %s2671_s20  ;;  %p92_p0 = scmp.ne.s32.totalorder %s2014_s27, %s2010_s26 }
  0x47   : > { %1638 = dma.hbm_to_vmem [thread:$0]  (!%p2197_p7), %s2624_s8, 4096, %s396_s12, [#allocation14], %s2591_s18, %s2591_s18, %s2593_s21  }
  0x48   : > { %p2251_p7 = por %p87_p13, %p86_p12  ;;  %p48_p2 = scmp.ge.s32.totalorder %s2673_s22, 2 }
  0x49   : > { %s103_s10 = ssub.s32 %s2030_s30, %s2671_s20  ;;  %p2264_p3 = por %p2592_p1, %p92_p0 }
  0x4a   : > { %s107_s5 = sadd.s32 1, %s2006_s25  ;;  %s2675_s22 = smov (%p48_p2, %s2673_s22), 0 }
  0x4b   : > { %2628 = sst [smem:[#allocation27_spill]] %s2675_s22  ;;  %p114_p6 = scmp.ne.s32.totalorder %s2006_s25, %s2002_s24 }
  0x4c   : > { %p338_p9 = scmp.eq.s32.totalorder %s2177_s15, 5  ;;  %s76_s7 = ssub.s32 %s2034_s13, %s2675_s22 }
  0x4d   : > { %p344_p10 = scmp.eq.s32.totalorder %s1438_s19, 5  ;;  %p77_p11 = scmp.eq.s32.totalorder %s76_s7, 0 }
  0x4e   : > { %s104_s18 = sor.u32 %s103_s10, %s76_s7  ;;  %p2278_p1 = por %p114_p6, %p87_p13 }
  0x4f   : > { %p105_p8 = scmp.eq.s32.totalorder %s104_s18, 0  ;;  %p2291_p2 = por %p338_p9, %p86_p12 }
  0x50   : > { %s2283_s4 = scalar_select %p77_p11, %s2018_s28, %s79_s23  }
  0x51   : > { %s2286_s6 = scalar_select %p105_p8, %s2006_s25, %s107_s5  }
  0x52   : > { %2630 = sst [smem:[#allocation28_spill]] %s2283_s4  ;;  %p2298_p4 = por %p344_p10, %p92_p0 }
  0x53   : > { %2631 = sst [smem:[#allocation29_spill]] %s2286_s6  ;;  %p1653_p13 = scmp.lt.s32.totalorder %s2038_s14, 6 }
  0x54   : > { %s2632_s8 = scalar_select %p2291_p2, 1, 0 }
  0x55   : > { %s2634_s19 = scalar_select %p2298_p4, 1, 0 }
  0x56   : > { %2633 = sst [smem:[#allocation30_spill]] %s2632_s8  ;;  %s425_s18 = sand.u32 1, %s2018_s28  }
  0x57   : > { %2635 = sst [smem:[#allocation31_spill]] %s2634_s19  ;;  %s1444_s10 = sshll.u32 %s425_s18, 3 }
  0x58   : > { %s1445_s7 = sshll.u32 %s2034_s13, 7  ;;  %s2636_s1 = sld [smem:[#allocation32_spill]] }
  0x59   : > { %s429_s5 = scalar_lea.vmem [#allocation7], %s1444_s10  ;;  %p2310_p12 = pnand %p1653_p13, %p2251_p7 }
  0x5a   : > { %s436_s4 = sshll.u32 %s429_s5, 4  ;;  %s1610_s26 = smul.u32 24, %s2034_s13  ;;  %s437_s4 = int_to_ptr.vmem [resolvable:$true] %s436_s4 }
  0x5b   : > { %p2317_p0 = pnand %p1653_p13, %p2278_p1  ;;  %s443_s28 = sand.u32 1, %s2038_s14  }
  0x5c   : > { %s426_s8 = scalar_lea.sflag [#allocation8], %s425_s18  ;;  %p1852_p6 = pneg %p2310_p12 }
  0x5d   : > { %s1863_s20 = scalar_lea.vmem %s437_s4, 128  ;;  %s2045_s22 = smov [#allocation7]  }
  0x5e   : > { %s434_s23 = scalar_lea.hbm %s2636_s1, %s1445_s7  ;;  %p1864_p9 = scmp.ne.s32.totalorder %s437_s4, %s1863_s20 }
  0x5f   : > { %s1868_s12 = sshll.u32 %s2045_s22, 4  ;;  %s1869_s12 = int_to_ptr.vmem [resolvable:$false] %s1868_s12 }
  0x60   : > { %p1866_p10 = pnand %p1864_p9, %p1852_p6  ;;  %s1870_s10 = scalar_lea.vmem %s1869_s12, 256 }
  0x61   : > { %p1871_p7 = scmp.lt.s32.totalorder %s437_s4, %s1869_s12  ;;  %p1872_p8 = scmp.lt.s32.totalorder %s1870_s10, %s1863_s20 }
  0x62   : > { %p1867_p11 = pneg %p1866_p10 }
  0x63   : > { %p1873_p4 = por %p1872_p8, %p1871_p7 }
  0x65   : > { %p1874_p2 = pnand %p1873_p4, %p1867_p11 }
  0x67   : > { %1877 = shalt.err (!%p1874_p2)
}
  0x68   : > { %1642 = dma.hbm_to_vmem [thread:$0]  (!%p2310_p12), %s434_s23, 128, %s437_s4, %s426_s8  }
  0x69   : > { %s445_s21 = sand.u32 1, %s2006_s25   ;;  %s453_s18 = sadd.s32 %s2030_s30, %s1610_s26 }
  0x6a   : > { %s1446_s7 = sshll.u32 %s445_s21, 6  ;;  %s1449_s5 = sshll.u32 %s453_s18, 7 }
  0x6b   : > { %s455_s22 = scalar_lea.hbm %s2579_s2, %s1449_s5  ;;  %s447_s14 = scalar_lea.vmem [#allocation10], %s1446_s7 }
  0x6c   : > { %s456_s12 = sshll.u32 %s447_s14, 4  ;;  %s444_s20 = scalar_lea.sflag [#allocation11], %s443_s28  ;;  %s457_s12 = int_to_ptr.vmem [resolvable:$true] %s456_s12 }
  0x6d   : > { %p1880_p1 = pneg %p2317_p0  ;;  %s1891_s10 = scalar_lea.vmem %s457_s12, 1024 }
  0x6e   : > { %p1892_p4 = scmp.ne.s32.totalorder %s457_s12, %s1891_s10  ;;  %s2046_s6 = smov [#allocation10]  }
  0x6f   : > { %s1896_s4 = sshll.u32 %s2046_s6, 4  ;;  %s1897_s4 = int_to_ptr.vmem [resolvable:$false] %s1896_s4 }
  0x70   : > { %p1894_p2 = pnand %p1892_p4, %p1880_p1  ;;  %s1898_s8 = scalar_lea.vmem %s1897_s4, 2048 }
  0x71   : > { %p1899_p12 = scmp.lt.s32.totalorder %s457_s12, %s1897_s4  ;;  %p1900_p6 = scmp.lt.s32.totalorder %s1898_s8, %s1891_s10 }
  0x72   : > { %p1895_p13 = pneg %p1894_p2 }
  0x73   : > { %p1901_p9 = por %p1900_p6, %p1899_p12 }
  0x75   : > { %p1902_p10 = pnand %p1901_p9, %p1895_p13 }
  0x77   : > { %1905 = shalt.err (!%p1902_p10)
}
  0x78   : > { %s2047_s1 = smov 384   ;;  %s2639_s26 = smov 8  }
  0x79   : > { %s2640_s28 = smov 128   ;;  %475 = sbr.rel (%p2189_p5) target bundleno = 1636 (0x664), region = 68 }
  0x7a   : > { %1645 = dma.hbm_to_vmem [thread:$0]  (!%p2317_p0), %s455_s22, 1024, %s457_s12, %s444_s20, %s2047_s1, %s2640_s28, %s2639_s26  }
  0x7b   : > { %s2340_s13 = sand.u32 (!%p2189_p5), 1, %s2014_s27  }
  0x7c   : > { %s1451_s14 = sshll.u32 (!%p2189_p5), %s2340_s13, 3  ;;  %s478_s23 = scalar_lea.sflag (!%p2189_p5), [#allocation8], %s2340_s13 }
  0x7d   : > { %s2344_s21 = scalar_lea.vmem (!%p2189_p5), [#allocation7], %s1451_s14 }
  0x7e   : > { %1977 = dma.done.wait (%p2264_p3), %s478_s23, 128  }
  0x7f   : > { %1979 = vsyncadd (%p2264_p3), %s478_s23, 4294967168  ;;  %s486_s17 = sand.u32 1, %s2177_s15   ;;  %s488_s19 = sand.u32 1, %s2002_s24  }
  0x80   : > { %s1452_s18 = sshll.u32 %s488_s19, 6  ;;  %s487_s7 = scalar_lea.sflag [#allocation11], %s486_s17 }
  0x81   : > { %s2352_s5 = scalar_lea.vmem [#allocation10], %s1452_s18  ;;  %p2641_p5 = scmp.ne.s32.totalorder %s2619_s16, 0 }
  0x83   : > { %1981 = dma.done.wait (%p2641_p5), %s487_s7, 1024  }
  0x84   : > { %1983 = vsyncadd (%p2641_p5), %s487_s7, 4294966272  ;;  %p2642_p0 = scmp.eq.s32.totalorder %s2177_s15, 0 }
  0x86   : > { %1985 = dma.done.wait (%p2642_p0), [#allocation11], 2048   ;;  %p2643_p11 = pmov %p2642_p0 }
  0x87   : > { %p2644_p3 = pmov %p2642_p0 }
  0x88   : > { %1987 = vsyncadd (%p2643_p11), [#allocation11], 4294965248 }
  0x89   : > { %1989 = dma.done.wait (%p2644_p3), [#allocation14], 6144   ;;  %p2645_p7 = pmov %p2642_p0 }
  0x8a   : > { %p556_p8 = scmp.lt.s32.totalorder %s2026_s29, 1  ;;  %s2378_s8 = scalar_lea.vmem [#allocation16], %s1451_s14 }
  0x8b   : > { %1991 = vsyncadd (%p2645_p7), [#allocation14], 4294961152  ;;  %p1459_p1 = scmp.ne.s32.totalorder %s2022_s11, 0 }
  0x8c   : > { %s557_s9 = scalar_select %p556_p8, %s2026_s29, 1 }
  0x8d   : > { %568 = sbr.rel (%p1459_p1) target bundleno = 800 (0x320), region = 92  ;;  %s2646_s26 = sld [smem:[#allocation34_spill]] (!%p1459_p1) }
  0x8e   : > { %s1457_s22 = sshll.u32 %s557_s9, 3  ;;  %s2647_s23 = sld [smem:[#allocation36_spill]] (!%p1459_p1) }
  0x8f   : > { %s2371_s20 = scalar_lea.vmem %s2577_s0, %s1457_s22  ;;  %s2376_s4 = scalar_lea.vmem %s2580_s3, %s1457_s22 }
  0x90   : > { %s2648_s18 = sld [smem:[#allocation38_spill]] (!%p1459_p1) }
  0x92   : > { %v585_v1 = vld [vmem:[#allocation12 + $0x78] sm:$0xff]  ;;  %v2048_v2 = vmov 0.0   ;;  %v584_v3 = vld [vmem:[#allocation12 + $0x70] sm:$0xff]  ;;  %vm2049_vm0 = vmmov 0   ;;  %v583_v4 = vld [vmem:[#allocation12 + $0x68] sm:$0xff]  ;;  %vm877_vm1 = vcmask 7168  }
  0x93   : > { %1540 = vmatprep.subr.mxu0 %v2048_v2  ;;  %880 = vst [vmem:[#allocation5] sm:$0xff] %v2048_v2  ;;  %1572 = vmatprep.mubr.msk.f32.mxu0 %vm2049_vm0, %v2048_v2  ;;  %v582_v5 = vld [vmem:[#allocation12 + $0x60] sm:$0xff]  ;;  %v679_v6 = vld [vmem:[#allocation13 + $0x78] sm:$0xff]  ;;  %v678_v7 = vld [vmem:[#allocation13 + $0x70] sm:$0xff] }
  0x94   : > { %1541 = vmatpush3.msra.mxu0 %v585_v1  ;;  %1575 = vmatprep.subr.mxu1 %v2048_v2  ;;  %v581_v8 = vld [vmem:[#allocation12 + $0x58] sm:$0xff]  ;;  %v677_v9 = vld [vmem:[#allocation13 + $0x68] sm:$0xff]  ;;  %v580_v10 = vld [vmem:[#allocation12 + $0x50] sm:$0xff]  ;;  %879 = vst.msk [vmem:[#allocation4] sm:$0xff] %vm877_vm1, %v2048_v2 }
  0x95   : > { %1542 = vmatprep.subr.mxu0 %v2048_v2  ;;  %1607 = vmatprep.mubr.msk.f32.mxu1 %vm2049_vm0, %v2048_v2  ;;  %v676_v11 = vld [vmem:[#allocation13 + $0x60] sm:$0xff]  ;;  %v579_v12 = vld [vmem:[#allocation12 + $0x48] sm:$0xff]  ;;  %v675_v13 = vld [vmem:[#allocation13 + $0x58] sm:$0xff] }
  0x96   : > { %1543 = vmatpush3.msra.mxu0 %v584_v3  ;;  %1576 = vmatpush3.msra.mxu1 %v679_v6  ;;  %v578_v14 = vld [vmem:[#allocation12 + $0x40] sm:$0xff]  ;;  %v674_v15 = vld [vmem:[#allocation13 + $0x50] sm:$0xff]  ;;  %v577_v16 = vld [vmem:[#allocation12 + $0x38] sm:$0xff] }
  0x97   : > { %1544 = vmatprep.subr.mxu0 %v2048_v2  ;;  %1577 = vmatprep.subr.mxu1 %v2048_v2  ;;  %v673_v17 = vld [vmem:[#allocation13 + $0x48] sm:$0xff]  ;;  %v576_v18 = vld [vmem:[#allocation12 + $0x30] sm:$0xff]  ;;  %v574_v20 = vld [vmem:[#allocation12 + $0x20] sm:$0xff] }
  0x98   : > { %1545 = vmatpush3.msra.mxu0 %v583_v4  ;;  %1578 = vmatpush3.msra.mxu1 %v678_v7  ;;  %v575_v19 = vld [vmem:[#allocation12 + $0x28] sm:$0xff]  ;;  %v573_v21 = vld [vmem:[#allocation12 + $0x18] sm:$0xff]  ;;  %v572_v22 = vld [vmem:[#allocation12 + $0x10] sm:$0xff] }
  0x99   : > { %1546 = vmatprep.subr.mxu0 %v2048_v2  ;;  %1579 = vmatprep.subr.mxu1 %v2048_v2  ;;  %v571_v23 = vld [vmem:[#allocation12 + $0x8] sm:$0xff]  ;;  %v570_v24 = vld [vmem:[#allocation12] sm:$0xff]  ;;  %v671_v27 = vld [vmem:[#allocation13 + $0x38] sm:$0xff] }
  0x9a   : > { %1547 = vmatpush3.msra.mxu0 %v582_v5  ;;  %1580 = vmatpush3.msra.mxu1 %v677_v9  ;;  %v569_v25 = vld [vmem:[%s2371_s20] sm:$0xff]  ;;  %v672_v26 = vld [vmem:[#allocation13 + $0x40] sm:$0xff]  ;;  %v667_v31 = vld [vmem:[#allocation13 + $0x18] sm:$0xff] }
  0x9b   : > { %1548 = vmatprep.subr.mxu0 %v2048_v2  ;;  %1581 = vmatprep.subr.mxu1 %v2048_v2  ;;  %v670_v28 = vld [vmem:[#allocation13 + $0x30] sm:$0xff]  ;;  %v669_v29 = vld [vmem:[#allocation13 + $0x28] sm:$0xff]  ;;  %v668_v30 = vld [vmem:[#allocation13 + $0x20] sm:$0xff] }
  0x9c   : > { %1549 = vmatpush3.msra.mxu0 %v581_v8  ;;  %1582 = vmatpush3.msra.mxu1 %v676_v11  ;;  %v666_v32 = vld [vmem:[#allocation13 + $0x10] sm:$0xff]  ;;  %v665_v33 = vld [vmem:[#allocation13 + $0x8] sm:$0xff]  ;;  %v664_v34 = vld [vmem:[#allocation13] sm:$0xff] }
  0x9d   : > { %1550 = vmatprep.subr.mxu0 %v2048_v2  ;;  %1583 = vmatprep.subr.mxu1 %v2048_v2  ;;  %v789_v35 = vld [vmem:[#allocation15 + $0xf8] sm:$0xff]  ;;  %v788_v37 = vld [vmem:[#allocation15 + $0xf0] sm:$0xff]  ;;  %v787_v39 = vld [vmem:[#allocation15 + $0xe8] sm:$0xff] }
  0x9e   : > { %1551 = vmatpush3.msra.mxu0 %v580_v10  ;;  %1584 = vmatpush3.msra.mxu1 %v675_v13  ;;  %v773_v36 = vld [vmem:[#allocation15 + $0x78] sm:$0xff]  ;;  %v772_v38 = vld [vmem:[#allocation15 + $0x70] sm:$0xff]  ;;  %v771_v40 = vld [vmem:[#allocation15 + $0x68] sm:$0xff] }
  0x9f   : > { %1552 = vmatprep.subr.mxu0 %v2048_v2  ;;  %1585 = vmatprep.subr.mxu1 %v2048_v2  ;;  %v786_v41 = vld [vmem:[#allocation15 + $0xe0] sm:$0xff]  ;;  %v785_v43 = vld [vmem:[#allocation15 + $0xd8] sm:$0xff]  ;;  %v784_v45 = vld [vmem:[#allocation15 + $0xd0] sm:$0xff] }
  0xa0   : > { %1553 = vmatpush3.msra.mxu0 %v579_v12  ;;  %1586 = vmatpush3.msra.mxu1 %v674_v15  ;;  %v770_v42 = vld [vmem:[#allocation15 + $0x60] sm:$0xff]  ;;  %v769_v44 = vld [vmem:[#allocation15 + $0x58] sm:$0xff]  ;;  %v768_v46 = vld [vmem:[#allocation15 + $0x50] sm:$0xff] }
  0xa1   : > { %1554 = vmatprep.subr.mxu0 %v2048_v2  ;;  %1587 = vmatprep.subr.mxu1 %v2048_v2  ;;  %v783_v47 = vld [vmem:[#allocation15 + $0xc8] sm:$0xff]  ;;  %v782_v49 = vld [vmem:[#allocation15 + $0xc0] sm:$0xff]  ;;  %v781_v51 = vld [vmem:[#allocation15 + $0xb8] sm:$0xff] }
  0xa2   : > { %1555 = vmatpush3.msra.mxu0 %v578_v14  ;;  %1588 = vmatpush3.msra.mxu1 %v673_v17  ;;  %v767_v48 = vld [vmem:[#allocation15 + $0x48] sm:$0xff]  ;;  %v766_v50 = vld [vmem:[#allocation15 + $0x40] sm:$0xff]  ;;  %v765_v52 = vld [vmem:[#allocation15 + $0x38] sm:$0xff]  ;;  %v2050_v14 = vmov -inf  }
  0xa3   : > { %1556 = vmatprep.subr.mxu0 %v2048_v2  ;;  %1589 = vmatprep.subr.mxu1 %v2048_v2  ;;  %v780_v53 = vld [vmem:[#allocation15 + $0xb0] sm:$0xff]  ;;  %v779_v55 = vld [vmem:[#allocation15 + $0xa8] sm:$0xff]  ;;  %v778_v57 = vld [vmem:[#allocation15 + $0xa0] sm:$0xff]  ;;  %878 = vst.msk [vmem:[#allocation3] sm:$0xff] %vm877_vm1, %v2050_v14 }
  0xa4   : > { %1557 = vmatpush3.msra.mxu0 %v577_v16  ;;  %1590 = vmatpush3.msra.mxu1 %v672_v26  ;;  %v764_v54 = vld [vmem:[#allocation15 + $0x30] sm:$0xff]  ;;  %v763_v56 = vld [vmem:[#allocation15 + $0x28] sm:$0xff]  ;;  %v762_v58 = vld [vmem:[#allocation15 + $0x20] sm:$0xff] }
  0xa5   : > { %1558 = vmatprep.subr.mxu0 %v2048_v2  ;;  %1591 = vmatprep.subr.mxu1 %v2048_v2  ;;  %v777_v59 = vld [vmem:[#allocation15 + $0x98] sm:$0xff]  ;;  %v776_v61 = vld [vmem:[#allocation15 + $0x90] sm:$0xff]  ;;  %v1460_v63 = vld [vmem:[%s2646_s26] ss:$0 sm:$0xff] }
  0xa6   : > { %1559 = vmatpush3.msra.mxu0 %v576_v18  ;;  %1592 = vmatpush3.msra.mxu1 %v671_v27  ;;  %v761_v60 = vld [vmem:[#allocation15 + $0x18] sm:$0xff]  ;;  %v760_v62 = vld [vmem:[#allocation15 + $0x10] sm:$0xff]  ;;  %v775_v5 = vld [vmem:[#allocation15 + $0x88] sm:$0xff] }
  0xa7   : > { %1560 = vmatprep.subr.mxu0 %v2048_v2  ;;  %1593 = vmatprep.subr.mxu1 %v2048_v2  ;;  %v759_v6 = vld [vmem:[#allocation15 + $0x8] sm:$0xff]  ;;  %v774_v7 = vld [vmem:[#allocation15 + $0x80] sm:$0xff]  ;;  %v757_v12 = vld [vmem:[%s2344_s21] sm:$0xff]  ;;  %s2649_s21 = sld [smem:[#allocation39_spill]] }
  0xa8   : > { %1561 = vmatpush3.msra.mxu0 %v575_v19  ;;  %1594 = vmatpush3.msra.mxu1 %v670_v28  ;;  %v758_v8 = vld [vmem:[#allocation15] sm:$0xff]  ;;  %v1461_v9 = vld [vmem:[%s2647_s23] ss:$0 sm:$0xff] }
  0xa9   : > { %1562 = vmatprep.subr.mxu0 %v2048_v2  ;;  %1595 = vmatprep.subr.mxu1 %v2048_v2  ;;  %v1462_v16 = vld [vmem:[%s2648_s18] ss:$0 sm:$0xff] }
  0xaa   : > { %1563 = vmatpush3.msra.mxu0 %v574_v20  ;;  %1596 = vmatpush3.msra.mxu1 %v669_v29 }
  0xab   : > { %1564 = vmatprep.subr.mxu0 %v2048_v2  ;;  %1597 = vmatprep.subr.mxu1 %v2048_v2 }
  0xac   : > { %1565 = vmatpush3.msra.mxu0 %v573_v21  ;;  %1598 = vmatpush3.msra.mxu1 %v668_v30 }
  0xad   : > { %1566 = vmatprep.subr.mxu0 %v2048_v2  ;;  %1599 = vmatprep.subr.mxu1 %v2048_v2  ;;  %v1463_v20 = vld [vmem:[%s2649_s21] ss:$0 sm:$0xff] }
  0xae   : > { %1567 = vmatpush3.msra.mxu0 %v572_v22  ;;  %1600 = vmatpush3.msra.mxu1 %v667_v31 }
  0xaf   : > { %1568 = vmatprep.subr.mxu0 %v2048_v2  ;;  %1601 = vmatprep.subr.mxu1 %v2048_v2 }
  0xb0   : > { %1569 = vmatpush3.msra.mxu0 %v571_v23  ;;  %1602 = vmatpush3.msra.mxu1 %v666_v32 }
  0xb1   : > { %1570 = vmatprep.subr.mxu0 %v2048_v2  ;;  %1603 = vmatprep.subr.mxu1 %v2048_v2 }
  0xb2   : > { %1571 = vmatpush3.msra.mxu0 %v570_v24  ;;  %1604 = vmatpush3.msra.mxu1 %v665_v33 }
  0xb3   : > { %1573 = vmatmul.mubr.f32.vlgmr.msra.gmra.mxu0 %v569_v25  ;;  %1605 = vmatprep.subr.mxu1 %v2048_v2 }
  0xb4   : > { %1606 = vmatpush3.msra.mxu1 %v664_v34  ;;  %1505 = vmatprep.subr.mxu0 %v789_v35 }
  0xb5   : > { %1506 = vmatpush3.msra.mxu0 %v773_v36 }
  0xb6   : > { %1507 = vmatprep.subr.mxu0 %v788_v37 }
  0xb7   : > { %1508 = vmatpush3.msra.mxu0 %v772_v38 }
  0xb8   : > { %1509 = vmatprep.subr.mxu0 %v787_v39 }
  0xb9   : > { %1510 = vmatpush3.msra.mxu0 %v771_v40 }
  0xba   : > { %1511 = vmatprep.subr.mxu0 %v786_v41 }
  0xbb   : > { %1512 = vmatpush3.msra.mxu0 %v770_v42 }
  0xbc   : > { %1513 = vmatprep.subr.mxu0 %v785_v43 }
  0xbd   : > { %1514 = vmatpush3.msra.mxu0 %v769_v44 }
  0xbe   : > { %1515 = vmatprep.subr.mxu0 %v784_v45 }
  0xbf   : > { %1516 = vmatpush3.msra.mxu0 %v768_v46 }
  0xc0   : > { %1517 = vmatprep.subr.mxu0 %v783_v47 }
  0xc1   : > { %1518 = vmatpush3.msra.mxu0 %v767_v48 }
  0xc2   : > { %1519 = vmatprep.subr.mxu0 %v782_v49 }
  0xc3   : > { %1520 = vmatpush3.msra.mxu0 %v766_v50 }
  0xc4   : > { %1521 = vmatprep.subr.mxu0 %v781_v51 }
  0xc5   : > { %1522 = vmatpush3.msra.mxu0 %v765_v52 }
  0xc6   : > { %1523 = vmatprep.subr.mxu0 %v780_v53 }
  0xc7   : > { %1524 = vmatpush3.msra.mxu0 %v764_v54 }
  0xc8   : > { %1525 = vmatprep.subr.mxu0 %v779_v55 }
  0xc9   : > { %1526 = vmatpush3.msra.mxu0 %v763_v56 }
  0xca   : > { %1527 = vmatprep.subr.mxu0 %v778_v57 }
  0xcb   : > { %1528 = vmatpush3.msra.mxu0 %v762_v58 }
  0xcc   : > { %1529 = vmatprep.subr.mxu0 %v777_v59 }
  0xcd   : > { %1530 = vmatpush3.msra.mxu0 %v761_v60 }
  0xce   : > { %1531 = vmatprep.subr.mxu0 %v776_v61 }
  0xcf   : > { %1532 = vmatpush3.msra.mxu0 %v760_v62 }
  0xd0   : > { %1533 = vmatprep.subr.mxu0 %v775_v5 }
  0xd1   : > { %1534 = vmatpush3.msra.mxu0 %v759_v6 }
  0xd2   : > { %1535 = vmatprep.subr.mxu0 %v774_v7 }
  0xd3   : > { %1536 = vmatpush3.msra.mxu0 %v758_v8 }
 0x173   : > { %v659_v0 = vpop.f32.mrf.mxu0 }
 0x174   : > { %v660_v1 = vadd.f32 %v1460_v63, %v659_v0 }
 0x175   : > { %v1574_v3 = vpop.f32.mrf.mxu0 }
 0x176   : > { %1758 = vtanh.f32 %v660_v1 }
 0x183   : > { %v1759_v4 = vpop.eup %1758 }
 0x184   : > { %1608 = vmatmul.mubr.f32.vlgmr.msra.gmra.mxu1 %v1759_v4 }
 0x244   : > { %v753_v10 = vpop.f32.mrf.mxu1 }
 0x245   : > { %v754_v11 = vadd.f32 %v1461_v9, %v753_v10 }
 0x246   : > { %v1609_v13 = vpop.f32.mrf.mxu1 }
 0x247   : > { %861 = vmatprep.mubr.f32.mxu0 %v754_v11 }
 0x248   : > { %862 = vmatmul.mubr.f32.vlgmr.msra.gmra.mxu0 %v757_v12 }
 0x308   : > { %v1537_v15 = vpop.f32.mrf.mxu0 }
 0x30a   : > { %v1538_v17 = vpop.f32.mrf.mxu0 }
 0x30b   : > { %v1539_v18 = vadd.f32 %v1538_v17, %v1537_v15 }
 0x30d   : > { %v864_v19 = vadd.f32 %v1539_v18, %v1462_v16 }
 0x30f   : > { %1760 = vtanh.f32 %v864_v19 }
 0x31c   : > { %v1761_v21 = vpop.eup %1760 }
 0x31d   : > { %v875_v22 = vmul.f32 %v1761_v21, %v1463_v20 }
 0x31f   : > { %876 = vst [vmem:[#allocation2] sm:$0xff] %v875_v22 }
 0x320 PF: > { %v895_v23 = vlaneseq  ;;  %v2051_v24 = vmov 1966171168   ;;  %v2052_v25 = vmov 0   ;;  %v2439_v38 = vld [vmem:[%s2352_s5] sm:$0xff]  ;;  %v2447_v44 = vld [vmem:[%s2352_s5 + $0x10] sm:$0xff]  ;;  %v2452_v48 = vld [vmem:[%s2352_s5 + $0x28] sm:$0xff] }
 0x321   : > { %v893_v2 = vunpack.c.l.s4 %v2051_v24  ;;  %1762 = vset.pattern.permute.xlu0 %v2052_v25  ;;  %1763 = vset.pattern.permute.xlu1 %v2052_v25  ;;  %v2444_v43 = vld [vmem:[%s2352_s5 + $0x20] sm:$0xff]  ;;  %v2459_v55 = vld [vmem:[%s2352_s5 + $0x8] sm:$0xff]  ;;  %v2464_v59 = vld [vmem:[%s2352_s5 + $0x18] sm:$0xff]  ;;  %vm1072_vm2 = vcmask 1041409   ;;  %vm1074_vm3 = vcmask 1042434   ;;  %vm1076_vm4 = vcmask 1043459  }
 0x322   : > { %v2432_v27 = vshrl.u32 %v895_v23, 7  ;;  %v2469_v62 = vld [vmem:[%s2352_s5 + $0x30] sm:$0xff]  ;;  %v2474_v1 = vld [vmem:[%s2352_s5 + $0x38] sm:$0xff]  ;;  %v1464_v6 = vld [vmem:[#allocation6] ss:$0 sm:$0xff]  ;;  %v1023_v12 = vand.u32 127, %v895_v23 }
 0x323   : > { %v894_v29 = vunpack.c.0.s8 %v893_v2  ;;  %v1027_v5 = vld [vmem:[%s2376_s4] sm:$0xff]  ;;  %s1465_s5 = sshll.u32 %s2022_s11, 3  ;;  %vm1078_vm5 = vcmask 1044484   ;;  %vm1080_vm6 = vcmask 1045509   ;;  %vm1082_vm7 = vcmask 1046534   ;;  %p1466_p4 = scmp.ne.s32.totalorder %s2022_s11, 2 }
 0x324   : > { %v2436_v32 = vsub.s32 0, %v2432_v27  ;;  %v1042_v15 = vsub.s32 %v1023_v12, %v2432_v27  ;;  %v1025_v17 = vstv %s1465_s5  ;;  %vm1084_vm8 = vcmask 1047559  }
 0x325   : > { %v897_v30 = vsub.s32 %v894_v29, %v2432_v27  ;;  %v1026_v23 = vadd.s32 %v1025_v17, %v1023_v12  ;;  %vm1089_vm10 = vcmask 64512   ;;  %vm1111_vm11 = vcmask 7168  }
 0x326   : > { %v889_v26 = vld [vmem:[#allocation2] sm:$0xff]  ;;  %v1157_v12 = vsub.s32 5, %v2432_v27 }
 0x327   : > { %v891_v28 = vcombine.high %v889_v26, %v889_v26  ;;  %v898_v31 = vrot.slane %v889_v26, %v897_v30 }
 0x329   : > { %v905_v33 = vrot.slane %v891_v28, %v897_v30  ;;  %v914_v34 = vrot.slane %v898_v31, %v897_v30  ;;  %v906_v36 = vcombine.high %v898_v31, %v898_v31 }
 0x32b   : > { %v921_v35 = vrot.slane %v905_v33, %v897_v30  ;;  %v907_v37 = vcombine.high %v905_v33, %v905_v33  ;;  %v943_v39 = vrot.slane %v914_v34, %v2436_v32  ;;  %v936_v41 = vcombine.high %v914_v34, %v914_v34 }
 0x32c   : > { %v928_v42 = vrot.slane %v906_v36, %v897_v30 }
 0x32d   : > { %v959_v40 = vrot.slane %v921_v35, %v2436_v32  ;;  %v935_v45 = vrot.slane %v907_v37, %v897_v30  ;;  %v980_v46 = vmul.f32 %v943_v39, %v2439_v38  ;;  %v951_v47 = vrot.slane %v936_v41, %v2436_v32 }
 0x32e   : > { %v938_v50 = vcombine.high %v928_v42, %v928_v42  ;;  %v947_v53 = vrot.slane %v928_v42, %v2436_v32  ;;  %v937_v54 = vcombine.high %v921_v35, %v921_v35 }
 0x32f   : > { %v963_v49 = vrot.slane %v935_v45, %v2436_v32  ;;  %988 = vadd.xlane.f32.xlu0 %v980_v46  ;;  %v984_v51 = vmul.f32 %v959_v40, %v2444_v43  ;;  %v982_v52 = vmul.f32 %v951_v47, %v2447_v44  ;;  %v939_v58 = vcombine.high %v935_v45, %v935_v45 }
 0x330   : > { %v955_v57 = vrot.slane %v938_v50, %v2436_v32  ;;  %v981_v60 = vmul.f32 %v947_v53, %v2459_v55  ;;  %v967_v61 = vrot.slane %v937_v54, %v2436_v32 }
 0x331   : > { %992 = vadd.xlane.f32.xlu1 %v982_v52  ;;  %v985_v56 = vmul.f32 %v963_v49, %v2452_v48  ;;  %v971_v0 = vrot.slane %v939_v58, %v2436_v32 }
 0x332   : > { %v983_v63 = vmul.f32 %v955_v57, %v2464_v59  ;;  %v986_v3 = vmul.f32 %v967_v61, %v2469_v62  ;;  %v1136_v61 = vsub.s32 2, %v2432_v27 }
 0x333   : > { %996 = vadd.xlane.f32.xlu0 %v984_v51  ;;  %v987_v4 = vmul.f32 %v971_v0, %v2474_v1  ;;  %v1088_v51 = vld [vmem:[#allocation3] sm:$0xff] }
 0x335   : > { %998 = vadd.xlane.f32.xlu1 %v985_v56 }
 0x337   : > { %990 = vadd.xlane.f32.xlu0 %v981_v60 }
 0x339   : > { %994 = vadd.xlane.f32.xlu1 %v983_v63 }
 0x33b   : > { %1000 = vadd.xlane.f32.xlu0 %v986_v3 }
 0x33d   : > { %1002 = vadd.xlane.f32.xlu1 %v987_v4  ;;  %v1171_v4 = vsub.s32 7, %v2432_v27 }
 0x34e   : > { %1029 = vperm.xlu1 %1763, %v1027_v5   ;;  %v1129_v5 = vsub.s32 1, %v2432_v27 }
 0x351   : > { %1011 = vperm.xlu0 %1762, %v1464_v6  }
 0x3b8   : > { %v989_v7 = vpop.xlane.xlu0 %988 }
 0x3ba   : > { %v993_v9 = vpop.xlane.xlu1 %992 }
 0x3bc   : > { %v997_v8 = vpop.xlane.xlu0 %996 }
 0x3be   : > { %v999_v11 = vpop.xlane.xlu1 %998 }
 0x3c0   : > { %v991_v10 = vpop.xlane.xlu0 %990 }
 0x3c2   : > { %v995_v14 = vpop.xlane.xlu1 %994 }
 0x3c4   : > { %v1001_v13 = vpop.xlane.xlu0 %1000 }
 0x3c6   : > { %v1003_v22 = vpop.xlane.xlu1 %1002 }
 0x3ca   : > { %v1030_v34 = vpop.permute.xlu1 %1029 }
 0x3cb   : > { %vm1031_vm9 = vcmp.lt.s32.totalorder %v1026_v23, %v1030_v34 }
 0x3cc   : > { %v1012_v16 = vpop.permute.xlu0 %1011 }
 0x3cd   : > { %v1014_v18 = vadd.f32 %v1012_v16, %v989_v7  ;;  %v1015_v19 = vadd.f32 %v1012_v16, %v991_v10  ;;  %v1016_v20 = vadd.f32 %v1012_v16, %v993_v9  ;;  %v1017_v21 = vadd.f32 %v1012_v16, %v995_v14 }
 0x3ce   : > { %v1018_v24 = vadd.f32 %v1012_v16, %v997_v8  ;;  %v1019_v2 = vadd.f32 %v1012_v16, %v999_v11  ;;  %v1020_v29 = vadd.f32 %v1012_v16, %v1001_v13  ;;  %v1021_v30 = vadd.f32 %v1012_v16, %v1003_v22 }
 0x3cf   : > { %v1043_v25 = vrot.slane %v1014_v18, %v1042_v15  ;;  %v1047_v26 = vrot.slane %v1015_v19, %v1042_v15  ;;  %v1051_v28 = vrot.slane %v1016_v20, %v1042_v15  ;;  %v1055_v31 = vrot.slane %v1017_v21, %v1042_v15 }
 0x3d0   : > { %v1059_v35 = vrot.slane %v1018_v24, %v1042_v15  ;;  %v1063_v37 = vrot.slane %v1019_v2, %v1042_v15  ;;  %v1067_v40 = vrot.slane %v1020_v29, %v1042_v15  ;;  %v1071_v42 = vrot.slane %v1021_v30, %v1042_v15 }
 0x3d1   : > { %v1073_v33 = vsel %vm1072_vm2, %v1047_v26, %v1043_v25  ;;  %v1143_v8 = vsub.s32 3, %v2432_v27  ;;  %v1150_v10 = vsub.s32 4, %v2432_v27  ;;  %v1164_v14 = vsub.s32 6, %v2432_v27 }
 0x3d2   : > { %v1075_v36 = vsel %vm1074_vm3, %v1051_v28, %v1073_v33 }
 0x3d3   : > { %v1077_v39 = vsel %vm1076_vm4, %v1055_v31, %v1075_v36 }
 0x3d4   : > { %v1079_v41 = vsel %vm1078_vm5, %v1059_v35, %v1077_v39 }
 0x3d5   : > { %v1081_v45 = vsel %vm1080_vm6, %v1063_v37, %v1079_v41 }
 0x3d6   : > { %v1083_v46 = vsel %vm1082_vm7, %v1067_v40, %v1081_v45 }
 0x3d7   : > { %v1085_v47 = vsel %vm1084_vm8, %v1071_v42, %v1083_v46 }
 0x3d8   : > { %v1087_v49 = vsel %vm1031_vm9, %v1085_v47, -1e+30 }
 0x3d9   : > { %v1090_v50 = vsel %vm1089_vm10, %v1087_v49, -inf }
 0x3da   : > { %1091 = vmax.xlane.f32.xlu1 %v1090_v50 }
 0x463   : > { %v1092_v52 = vpop.xlane.xlu1 %1091 }
 0x464   : > { %v1093_v53 = vmax.f32 %v1088_v51, %v1092_v52 }
 0x466   : > { %v1094_v54 = vsub.f32 %v1088_v51, %v1093_v53  ;;  %1250 = vst.msk [vmem:[#allocation3] sm:$0xff] %vm1111_vm11, %v1093_v53  ;;  %1099 = vperm.xlu0 %1762, %v1093_v53  }
 0x468   : > { %v1095_v60 = vmul.f32 1.442695, %v1094_v54 }
 0x4e1   : > { %v1100_v56 = vpop.permute.xlu0 %1099 }
 0x4e2   : > { %v1102_v57 = vsub.f32 %v1087_v49, %v1100_v56 }
 0x4e4   : > { %v1103_v58 = vmul.f32 1.442695, %v1102_v57 }
 0x4e6   : > { %1765 = vpow2.f32 %v1103_v58 }
 0x4e7   : > { %1767 = vpow2.f32 %v1095_v60 }
 0x4f3   : > { %v1766_v63 = vpop.eup %1765 }
 0x4f4   : > { %v1137_v0 = vrot.slane %v1766_v63, %v1136_v61  ;;  %v1123_v3 = vrot.slane %v1766_v63, %v2436_v32  ;;  %v1172_v6 = vrot.slane %v1766_v63, %v1171_v4  ;;  %v1130_v7 = vrot.slane %v1766_v63, %v1129_v5  ;;  %v2497_v11 = vpop.eup %1767 }
 0x4f5   : > { %v1144_v9 = vrot.slane %v1766_v63, %v1143_v8  ;;  %v1151_v32 = vrot.slane %v1766_v63, %v1150_v10  ;;  %v1158_v13 = vrot.slane %v1766_v63, %v1157_v12  ;;  %v1165_v15 = vrot.slane %v1766_v63, %v1164_v14 }
 0x4f6   : > { %1139 = vbcast.lane.b32.xlu1 %v1137_v0, 256  ;;  %1125 = vbcast.lane.b32.xlu0 %v1123_v3, 256  ;;  %v1107_v16 = vsel %vm1089_vm10, %v1766_v63, 0.0 }
 0x4fa   : > { %1174 = vbcast.lane.b32.xlu1 %v1172_v6, 256  ;;  %1132 = vbcast.lane.b32.xlu0 %v1130_v7, 256 }
 0x4fe   : > { %1146 = vbcast.lane.b32.xlu0 %v1144_v9, 256  ;;  %1116 = vperm.xlu1 %1763, %v2497_v11  }
 0x502   : > { %1153 = vbcast.lane.b32.xlu0 %v1151_v32, 256 }
 0x506   : > { %1160 = vbcast.lane.b32.xlu0 %v1158_v13, 256 }
 0x50a   : > { %1167 = vbcast.lane.b32.xlu0 %v1165_v15, 256 }
 0x529   : > { %1108 = vadd.xlane.f32.xlu0 %v1107_v16 }
 0x568   : > { %v1126_v17 = vpop.permute.xlu0 %1125  ;;  %v1140_v18 = vpop.permute.xlu1 %1139 }
 0x569   : > { %v1176_v19 = vmul.f32 %v1126_v17, %v2439_v38  ;;  %v1178_v21 = vmul.f32 %v1140_v18, %v2447_v44 }
 0x56b   : > { %v1184_v24 = vrot.slane %v1176_v19, 4  ;;  %v1196_v27 = vrot.slane %v1178_v21, 4 }
 0x56c   : > { %v1133_v20 = vpop.permute.xlu0 %1132  ;;  %v1175_v2 = vpop.permute.xlu1 %1174 }
 0x56d   : > { %v1177_v22 = vmul.f32 %v1133_v20, %v2459_v55  ;;  %v1185_v23 = vadd.f32 %v1184_v24, %v1176_v19  ;;  %v1183_v29 = vmul.f32 %v1175_v2, %v2474_v1  ;;  %v1197_v38 = vadd.f32 %v1196_v27, %v1178_v21  ;;  %v1113_v19 = vld [vmem:[#allocation5] sm:$0xff] }
 0x56f   : > { %v1190_v25 = vrot.slane %v1177_v22, 4  ;;  %v1186_v35 = vrot.slane %v1185_v23, 2  ;;  %v1226_v36 = vrot.slane %v1183_v29, 4  ;;  %v1198_v42 = vrot.slane %v1197_v38, 2 }
 0x570   : > { %v1147_v26 = vpop.permute.xlu0 %1146 }
 0x571   : > { %v1191_v28 = vadd.f32 %v1190_v25, %v1177_v22  ;;  %v1179_v30 = vmul.f32 %v1147_v26, %v2464_v59  ;;  %v1187_v46 = vadd.f32 %v1186_v35, %v1185_v23  ;;  %v1227_v1 = vadd.f32 %v1226_v36, %v1183_v29  ;;  %v1105_v23 = vld [vmem:[#allocation4] sm:$0xff] }
 0x572   : > { %v1199_v53 = vadd.f32 %v1198_v42, %v1197_v38  ;;  %v1106_v29 = vmul.f32 %v2497_v11, %v1105_v23 }
 0x573   : > { %v1192_v31 = vrot.slane %v1191_v28, 2  ;;  %v1202_v33 = vrot.slane %v1179_v30, 4  ;;  %v1228_v57 = vrot.slane %v1227_v1, 2 }
 0x574   : > { %v1154_v34 = vpop.permute.xlu0 %1153 }
 0x575   : > { %v1203_v44 = vadd.f32 %v1202_v33, %v1179_v30  ;;  %v1180_v55 = vmul.f32 %v1154_v34, %v2444_v43  ;;  %v1193_v37 = vadd.f32 %v1192_v31, %v1191_v28  ;;  %v1188_v43 = vrot.slane %v1187_v46, 1 }
 0x576   : > { %v1229_v7 = vadd.f32 %v1228_v57, %v1227_v1 }
 0x577   : > { %v1204_v39 = vrot.slane %v1203_v44, 2  ;;  %v1208_v40 = vrot.slane %v1180_v55, 4  ;;  %v1194_v49 = vrot.slane %v1193_v37, 1  ;;  %v1189_v6 = vadd.f32 %v1188_v43, %v1187_v46 }
 0x578   : > { %v1161_v41 = vpop.permute.xlu0 %1160  ;;  %v1230_v14 = vrot.slane %v1229_v7, 1 }
 0x579   : > { %v1181_v45 = vmul.f32 %v1161_v41, %v2452_v48  ;;  %v1209_v47 = vadd.f32 %v1208_v40, %v1180_v55  ;;  %v1205_v50 = vadd.f32 %v1204_v39, %v1203_v44  ;;  %v1195_v63 = vadd.f32 %v1194_v49, %v1193_v37  ;;  %v1117_v20 = vpop.permute.xlu1 %1116 }
 0x57a   : > { %v1200_v48 = vrot.slane %v1199_v53, 1  ;;  %v1231_v24 = vadd.f32 %v1230_v14, %v1229_v7  ;;  %v1119_v25 = vmul.f32 %v1117_v20, %v1113_v19 }
 0x57b   : > { %v1214_v59 = vrot.slane %v1181_v45, 4  ;;  %v1210_v51 = vrot.slane %v1209_v47, 2  ;;  %v1206_v0 = vrot.slane %v1205_v50, 1  ;;  %v1240_v10 = vsel %vm1072_vm2, %v1195_v63, %v1189_v6 }
 0x57c   : > { %v1168_v52 = vpop.permute.xlu0 %1167  ;;  %v1201_v12 = vadd.f32 %v1200_v48, %v1199_v53 }
 0x57d   : > { %v1215_v54 = vadd.f32 %v1214_v59, %v1181_v45  ;;  %v1182_v56 = vmul.f32 %v1168_v52, %v2469_v62  ;;  %v1211_v58 = vadd.f32 %v1210_v51, %v1209_v47  ;;  %v1207_v32 = vadd.f32 %v1206_v0, %v1205_v50 }
 0x57e   : > { %v1241_v16 = vsel %vm1074_vm3, %v1201_v12, %v1240_v10 }
 0x57f   : > { %v1216_v60 = vrot.slane %v1215_v54, 2  ;;  %v1220_v61 = vrot.slane %v1182_v56, 4  ;;  %v1212_v3 = vrot.slane %v1211_v58, 1  ;;  %v1242_v18 = vsel %vm1076_vm4, %v1207_v32, %v1241_v16 }
 0x581   : > { %v1217_v4 = vadd.f32 %v1216_v60, %v1215_v54  ;;  %v1221_v5 = vadd.f32 %v1220_v61, %v1182_v56  ;;  %v1213_v62 = vadd.f32 %v1212_v3, %v1211_v58 }
 0x583   : > { %v1218_v8 = vrot.slane %v1217_v4, 1  ;;  %v1222_v9 = vrot.slane %v1221_v5, 2  ;;  %v1243_v21 = vsel %vm1078_vm5, %v1213_v62, %v1242_v18 }
 0x585   : > { %v1223_v13 = vadd.f32 %v1222_v9, %v1221_v5  ;;  %v1219_v15 = vadd.f32 %v1218_v8, %v1217_v4 }
 0x587   : > { %v1224_v17 = vrot.slane %v1223_v13, 1  ;;  %v1244_v2 = vsel %vm1080_vm6, %v1219_v15, %v1243_v21 }
 0x589   : > { %v1225_v22 = vadd.f32 %v1224_v17, %v1223_v13 }
 0x58b   : > { %v1245_v26 = vsel %vm1082_vm7, %v1225_v22, %v1244_v2 }
 0x58c   : > { %v1246_v27 = vsel %vm1084_vm8, %v1231_v24, %v1245_v26 }
 0x58d   : > { %v1248_v28 = vadd.f32 %v1246_v27, %v1119_v25 }
 0x58f   : > { %1249 = vst [vmem:[#allocation5] sm:$0xff] %v1248_v28 }
 0x5b1   : > { %1254 = sbr.rel (%p1466_p4) target bundleno = 1610 (0x64a), region = 96 }
 0x5b2   : > { %v1109_v30 = vpop.xlane.xlu0 %1108 }
 0x5b3   : > { %v1110_v31 = vadd.f32 %v1109_v30, %v1106_v29 }
 0x5b5   : > { %1112 = vst.msk [vmem:[#allocation4] sm:$0xff] %vm1111_vm11, %v1110_v31 }
 0x5b6   : > { %v2053_v34 = vmov 0   ;;  %v1255_v35 = vld [vmem:[#allocation5] sm:$0xff] }
 0x5b7   : > { %1769 = vset.pattern.permute.xlu0 %v2053_v34 }
 0x5bc   : > { %v1256_v33 = vld [vmem:[#allocation4] sm:$0xff] }
 0x5bd   : > { %1770 = vrcp.f32 %v1256_v33 }
 0x5ca   : > { %v1771_v38 = vpop.eup %1770 }
 0x5cb   : > { %1260 = vperm.xlu0 %1769, %v1771_v38  }
 0x646   : > { %v1261_v36 = vpop.permute.xlu0 %1260 }
 0x647   : > { %v1263_v44 = vmul.f32 %v1261_v36, %v1255_v35 }
 0x649   : > { %1264 = vst [vmem:[%s2378_s8] sm:$0xff] %v1263_v44 }
 0x64a PF: > { %s2650_s22 = sld [smem:[#allocation30_spill]]  ;;  %s1468_s12 = sshll.u32 %s2026_s29, 7 }
 0x64b   : > { %s2651_s20 = sld [smem:[#allocation40_spill]]  ;;  %s1279_s6 = sshll.u32 %s2378_s8, 4  ;;  %s1280_s6 = int_to_ptr.vmem [resolvable:$true] %s1279_s6 }
 0x64c   : > { %s1266_s4 = scalar_lea.sflag [#allocation9], %s2340_s13  ;;  %s1906_s15 = scalar_lea.vmem %s1280_s6, 128 }
 0x64d   : > { %p1907_p2 = scmp.ne.s32.totalorder %s1280_s6, %s1906_s15  ;;  %s2054_s1 = smov [#allocation16]  }
 0x64e   : > { %s1910_s26 = sshll.u32 %s2054_s1, 4  ;;  %s1911_s26 = int_to_ptr.vmem [resolvable:$false] %s1910_s26 }
 0x64f   : > { %s1912_s28 = scalar_lea.vmem %s1911_s26, 256  ;;  %p1913_p9 = scmp.lt.s32.totalorder %s1280_s6, %s1911_s26 }
 0x650   : > { %p2652_p13 = scmp.ne.s32.totalorder %s2650_s22, 0  ;;  %p1914_p10 = scmp.lt.s32.totalorder %s1912_s28, %s1906_s15 }
 0x651   : > { %s1277_s10 = scalar_lea.hbm %s2651_s20, %s1468_s12 }
 0x652   : > { %p1908_p12 = pnand %p1907_p2, %p2652_p13  ;;  %p1915_p5 = por %p1914_p10, %p1913_p9 }
 0x654   : > { %p1909_p6 = pneg %p1908_p12 }
 0x656   : > { %p1916_p0 = pnand %p1915_p5, %p1909_p6 }
 0x658   : > { %1919 = shalt.err (!%p1916_p0)
}
 0x659   : > { %s1920_s29 = scalar_lea.hbm %s1277_s10, 128  ;;  %s1924_s14 = scalar_lea.hbm %s2651_s20, 256 }
 0x65a   : > { %p1921_p11 = scmp.ne.s32.totalorder %s1277_s10, %s1920_s29  ;;  %p1925_p8 = scmp.lt.s32.totalorder %s1277_s10, %s2651_s20 }
 0x65b   : > { %p1926_p1 = scmp.lt.s32.totalorder %s1924_s14, %s1920_s29 }
 0x65c   : > { %p1922_p3 = pnand %p1921_p11, %p2652_p13 }
 0x65d   : > { %p1927_p4 = por %p1926_p1, %p1925_p8 }
 0x65e   : > { %p1923_p7 = pneg %p1922_p3 }
 0x660   : > { %p1928_p2 = pnand %p1927_p4, %p1923_p7 }
 0x662   : > { %1931 = shalt.err (!%p1928_p2)
}
 0x663   : > { %1627 = dma.vmem_to_hbm [thread:$0]  (%p2652_p13), %s1280_s6, 128, %s1277_s10, %s1266_s4  }
 0x664 PF: > { %s2653_s19 = sld [smem:[#allocation25_spill]] }
 0x665   : > { %s2654_s18 = sld [smem:[#allocation22_spill]] }
 0x666   : > { %s2655_s7 = sld [smem:[#allocation31_spill]] }
 0x66a   : > { %p1657_p12 = scmp.ge.s32.totalorder %s2653_s19, 2 }
 0x66b   : > { %s1291_s9 = sand.u32 1, %s2654_s18  }
 0x66c   : > { %p2656_p6 = scmp.ne.s32.totalorder %s2655_s7, 0  ;;  %s1292_s21 = scalar_lea.sflag [#allocation9], %s1291_s9 }
 0x66e   : > { %p1647_p9 = pnand %p1657_p12, %p2656_p6 }
 0x670   : > { %p1648_p10 = pneg %p1647_p9 }
 0x672   : > { %1993 = dma.done.wait (%p1648_p10), %s1292_s21, 128  }
 0x673   : > { %1995 = vsyncadd (%p1648_p10), %s1292_s21, 4294967168  ;;  %s34_s14 = sadd.s32 1, %s2653_s19   ;;  %s2657_s5 = sld [smem:[#allocation29_spill]] }
 0x674   : > { %p31_p5 = scmp.ge.s32.totalorder %s34_s14, 8   ;;  %s2658_s22 = sld [smem:[#allocation23_spill]] }
 0x675   : > { %s2659_s28 = sld [smem:[#allocation28_spill]]  ;;  %s2663_s23 = smov %s2002_s24 }
 0x676   : > { %s2660_s29 = sld [smem:[#allocation24_spill]]  ;;  %s2664_s24 = smov %s2006_s25 }
 0x677   : > { %s2661_s12 = sld [smem:[#allocation26_spill]]  ;;  %s2666_s26 = smov %s2014_s27 }
 0x678   : > { %s2662_s13 = sld [smem:[#allocation27_spill]]  ;;  %s2668_s11 = smov %s2030_s30 }
 0x679   : > { %s2665_s25 = smov %s2657_s5  ;;  %33 = sbr.rel (!%p31_p5) target bundleno = 22 (0x16), region = 152 }
 0x67a   : > { %s2667_s27 = smov %s2658_s22 }
 0x67d   : > { %s2669_s30 = smov %s2661_s12 }
 0x67e   :  { %1297 = vsyncpa [#allocation8], 1 }
 0x67f   :  { %1299 = vsyncpa [#allocation8 + $0x1], 1 }
 0x680   :  { %1300 = vsyncpa [#allocation11], 1 }
 0x681   :  { %1302 = vsyncpa [#allocation11 + $0x1], 1 }
 0x682   :  { %1303 = vsyncpa [#allocation14], 1 }
 0x683   :  { %1304 = vsyncpa [#allocation9], 1 }
 0x684   :  { %1306 = vsyncpa [#allocation9 + $0x1], 1 }

</bundles_post_ra>
